<compile_context>
chip_gen: v7x
topology: tpu7x:2x2x1
jax: 0.10.0
libtpu: 0.0.40
codegen_flags: <defaults>
</compile_context>

<pallas_src>
import functools

import jax
import jax.numpy as jnp
from jax.experimental import pallas as pl
from jax.experimental.pallas import tpu as pltpu


def _round_up(x, m):
    return ((x + m - 1) // m) * m


def _choose_row_tile(total_rows, *, max_tile=1024, sublane=16, num_cores=2):
    """Row tile: multiple of 16 (bf16 sublane packing), <= max_tile, with a
    balanced/even tile count so v7x's two TensorCores split the parallel grid
    (a no-op on v5e/v6e single-TC chips)."""
    rows = _round_up(total_rows, sublane)
    if rows <= sublane * num_cores:
        return rows                                   # too small to split
    n_tiles = num_cores * max(1, -(-rows // (num_cores * max_tile)))
    return _round_up(-(-rows // n_tiles), sublane)


def _resident_spec(block_shape):
    """Resident operand (constant index_map): single-buffered."""
    try:
        return pl.BlockSpec(block_shape, lambda i: (0, 0),
                            pipeline_mode=pl.Buffered(1))
    except TypeError:  # older jax without pipeline_mode on BlockSpec
        return pl.BlockSpec(block_shape, lambda i: (0, 0))


def recon_loss_kernel(emb_pos_ref, cell_ref, mat_ref, proj_neg_ref, part_ref,
                      *, total_rows, k_neg, tile_rows):
    emb_pos = emb_pos_ref[...]          # (T, Din)   bf16
    cell_f32 = cell_ref[...]            # (T, size)  f32
    mat_t = mat_ref[...]                # (Din, size) bf16, resident, pre-T
    proj_neg_t = proj_neg_ref[...]      # (size, KP)  bf16, resident, pre-T

    # proj_pos = emb_pos @ mat.T -> (T, size); native [M,K]x[K,N] MXU feed,
    # f32 accumulation.
    proj_pos = jnp.dot(emb_pos, mat_t, preferred_element_type=jnp.float32)

    # Positive score: per-row dot with the outside cell, kept in f32 for
    # parity with the PyTorch math (VPU + small lane reduce).
    xp = jnp.sum(proj_pos * cell_f32, axis=-1, keepdims=True)       # (T, 1)

    # Negative scores: cell @ proj_neg.T -> (T, KP); bf16 MXU LHS only here.
    xn = jnp.dot(cell_f32.astype(jnp.bfloat16), proj_neg_t,
                 preferred_element_type=jnp.float32)                # (T, KP)

    # Mask padded negative columns out of the softmax (exp underflows to 0).
    col = jax.lax.broadcasted_iota(jnp.int32, xn.shape, 1)
    xn = jnp.where(col < k_neg, xn, jnp.float32(-1e30))

    # Cross-entropy with target class 0 (the positive), concat-free:
    #   per_row = logsumexp([xp, xn]) - xp
    m = jnp.maximum(xp, jnp.max(xn, axis=-1, keepdims=True))        # (T, 1)
    lse = m + jnp.log(jnp.exp(xp - m) +
                      jnp.sum(jnp.exp(xn - m), axis=-1, keepdims=True))
    per_row = lse - xp                                              # (T, 1)

    # Mask rows of the ragged last tile (row padding never materialized in HBM).
    r0 = pl.program_id(0) * tile_rows
    row = jax.lax.broadcasted_iota(jnp.int32, per_row.shape, 0)
    per_row = jnp.where(r0 + row < total_rows, per_row, 0.0)

    # Per-tile partial sum, broadcast into a lane-dense (8, 128) output tile
    # (single unmasked store; no extra VPU multiply).
    part_ref[...] = jnp.full(part_ref.shape, jnp.sum(per_row), dtype=jnp.float32)


def reconstruction_softmax_loss(sentences, neg_samples, outside_h, emb_table,
                                mat, *, max_row_tile=1024):
    """Embedding gather + tiny proj_neg matmul in JAX glue, hot path in Pallas."""
    B, L = sentences.shape
    size = outside_h.shape[-1]
    d_in = emb_table.shape[-1]
    k_neg = int(neg_samples.shape[0])
    total_rows = B * L

    # --- plain-JAX glue (minimal HBM traffic) -------------------------------
    # One bf16 cast of the table, one bf16 gather; no f32 round trip, no pad.
    emb_table_bf16 = emb_table.astype(jnp.bfloat16)
    emb_pos = emb_table_bf16[sentences.reshape(-1)]                 # (rows, Din)
    cell = outside_h[:, :L].reshape(total_rows, size)               # (rows, size) f32

    # Hoisted negative projection (K x Din x size is tiny), pre-transposed to
    # (size, KP) and padded to a 128-lane multiple.
    proj_neg_f32 = jnp.matmul(emb_table[neg_samples].astype(jnp.float32),
                              mat.astype(jnp.float32).T)            # (K, size)
    kp = max(128, _round_up(k_neg, 128))
    proj_neg_t = jnp.zeros((size, kp), jnp.bfloat16).at[:, :k_neg].set(
        proj_neg_f32.T.astype(jnp.bfloat16))

    # Pre-transposed weight: (Din, size) so the kernel matmul needs no XLU.
    mat_t = mat.T.astype(jnp.bfloat16)

    # Row tiling (16-row aligned, balanced across 2 TCs on v7x).
    t = _choose_row_tile(total_rows, max_tile=max_row_tile)
    num_tiles = pl.cdiv(total_rows, t)

    # VMEM budget from the actual footprint (generation-aware cap).
    bf16, f32 = 2, 4
    vmem_footprint = (
        2 * t * d_in * bf16        # emb_pos tile, double-buffered
        + 2 * t * size * f32       # cell tile, double-buffered
        + d_in * size * bf16       # mat (resident, single-buffered)
        + size * kp * bf16         # proj_neg (resident, single-buffered)
        + 2 * 8 * 128 * f32        # output tiles
        + t * size * f32           # proj_pos temp
        + 3 * t * kp * f32         # xn + exp/where temps
        + 8 * t * f32              # xp / m / lse / per_row columns
    )
    vmem_limit = int(min(max(2 * vmem_footprint, 16 * 1024 * 1024),
                         40 * 1024 * 1024))

    flops = int(2 * total_rows * d_in * size          # proj_pos
                + 2 * total_rows * size * kp          # xn
                + 2 * total_rows * size)              # xp
    bytes_accessed = int(emb_pos.size * bf16 + cell.size * f32
                         + mat_t.size * bf16 + proj_neg_t.size * bf16
                         + num_tiles * 8 * 128 * f32)

    kernel = functools.partial(recon_loss_kernel, total_rows=total_rows,
                               k_neg=k_neg, tile_rows=t)

    partials = pl.pallas_call(
        kernel,
        out_shape=jax.ShapeDtypeStruct((num_tiles * 8, 128), jnp.float32),
        grid_spec=pltpu.PrefetchScalarGridSpec(
            num_scalar_prefetch=0,
            grid=(num_tiles,),
            in_specs=[
                pl.BlockSpec((t, d_in), lambda i: (i, 0)),    # emb_pos tile
                pl.BlockSpec((t, size), lambda i: (i, 0)),    # cell tile (f32)
                _resident_spec((d_in, size)),                 # mat.T  (resident)
                _resident_spec((size, kp)),                   # proj_neg.T (resident)
            ],
            out_specs=pl.BlockSpec((8, 128), lambda i: (i, 0)),
        ),
        compiler_params=pltpu.CompilerParams(
            dimension_semantics=("parallel",),
            vmem_limit_bytes=vmem_limit,
        ),
        cost_estimate=pl.CostEstimate(
            flops=flops,
            transcendentals=int(total_rows * (kp + 2)),
            bytes_accessed=bytes_accessed),
    )(emb_pos, cell, mat_t, proj_neg_t)

    # Tiny final reduction (one scalar per row tile) in plain JAX.
    per_tile = partials.reshape(num_tiles, 8, 128)[:, 0, 0]
    return jnp.sum(per_tile) / total_rows


# ----------------------------------------------------------------------------
# References for verification.
# ----------------------------------------------------------------------------
def reference_loss_f32(sentences, neg_samples, outside_h, emb_table, mat):
    """Pure-JAX f32 replica of the PyTorch forward (exact semantics)."""
    B, L = sentences.shape
    emb_pos = emb_table[sentences]                                 # (B, L, Din)
    emb_neg = emb_table[neg_samples][None]                         # (1, K, Din)
    cell = outside_h[:, :L][:, :, None, :]                         # (B, L, 1, size)
    proj_pos = jnp.matmul(emb_pos, mat.T)                          # (B, L, size)
    proj_neg = jnp.matmul(emb_neg, mat.T)                          # (1, K, size)
    xp = jnp.einsum('abc,abxc->abx', proj_pos, cell)               # (B, L, 1)
    xn = jnp.einsum('zec,abxc->abe', proj_neg, cell)               # (B, L, K)
    score = jnp.concatenate([xp, xn], axis=2).reshape(B * L, -1)
    lse = jax.scipy.special.logsumexp(score, axis=-1)
    return jnp.mean(lse - score[:, 0])


def reference_loss_matched(sentences, neg_samples, outside_h, emb_table, mat):
    """Same math as the kernel (bf16 MXU operands, f32 cell for xp, f32 acc)."""
    B, L = sentences.shape
    d_in = emb_table.shape[-1]
    size = outside_h.shape[-1]
    rows = B * L
    emb_pos = emb_table.astype(jnp.bfloat16)[sentences.reshape(-1)]
    cell = outside_h[:, :L].reshape(rows, size)                    # f32
    mat_t = mat.T.astype(jnp.bfloat16)                             # (Din, size)
    proj_neg_t = jnp.matmul(emb_table[neg_samples].astype(jnp.float32),
                            mat.astype(jnp.float32).T).T.astype(jnp.bfloat16)
    proj_pos = jnp.dot(emb_pos, mat_t, preferred_element_type=jnp.float32)
    xp = jnp.sum(proj_pos * cell, axis=-1, keepdims=True)
    xn = jnp.dot(cell.astype(jnp.bfloat16), proj_neg_t,
                 preferred_element_type=jnp.float32)
    score = jnp.concatenate([xp, xn], axis=-1)
    lse = jax.scipy.special.logsumexp(score, axis=-1)
    return jnp.mean(lse - score[:, 0])


if __name__ == "__main__":
    # Small shapes consistent with the module.
    batch_size = 2
    length = 8
    input_size = 32   # embedding dim
    size = 16         # diora hidden size
    k_neg = 3
    vocab = 50

    key = jax.random.PRNGKey(0)
    k1, k2, k3, k4, k5 = jax.random.split(key, 5)

    # Deterministic "parameters" (normal_() init like reset_parameters()).
    emb_table = jax.random.normal(k1, (vocab, input_size), dtype=jnp.float32)
    mat = jax.random.normal(k2, (size, input_size), dtype=jnp.float32)

    # Inputs.
    sentences = jax.random.randint(k3, (batch_size, length), 0, vocab,
                                   dtype=jnp.int32)
    neg_samples = jax.random.randint(k4, (k_neg,), 0, vocab, dtype=jnp.int32)
    outside_h = jax.random.normal(k5, (batch_size, length, size),
                                  dtype=jnp.float32)

    loss = reconstruction_softmax_loss(sentences, neg_samples, outside_h,
                                       emb_table, mat)
    loss = jax.block_until_ready(loss)

    # Tight check vs a reference using the same operand precisions.
    ref_matched = reference_loss_matched(sentences, neg_samples, outside_h,
                                         emb_table, mat)
    assert jnp.allclose(loss, ref_matched, rtol=2e-3, atol=2e-3), \
        (loss, ref_matched)

    # Loose sanity check vs the exact f32 PyTorch semantics (bf16 MXU operands
    # shift the loss at the ~1% level).
    ref_f32 = reference_loss_f32(sentences, neg_samples, outside_h,
                                 emb_table, mat)
    assert abs(float(loss) - float(ref_f32)) <= 0.1 * abs(float(ref_f32)) + 0.1, \
        (loss, ref_f32)

    print("KERNEL_OK")
</pallas_src>

<mosaic_0001>
module attributes {stable_mosaic.version = 11 : i64} {
  func.func @recon_loss_kernel(%arg0: i32, %arg1: memref<16x32xbf16, #tpu.memory_space<vmem>>, %arg2: memref<16x16xf32, #tpu.memory_space<vmem>>, %arg3: memref<32x16xbf16, #tpu.memory_space<vmem>>, %arg4: memref<16x128xbf16, #tpu.memory_space<vmem>>, %arg5: memref<8x128xf32, #tpu.memory_space<vmem>>) attributes {dimension_semantics = [#tpu.dimension_semantics<parallel>], iteration_bounds = array<i64: 1>, scalar_prefetch = 0 : i64, scratch_operands = 0 : i64, tpu.core_type = #tpu.core_type<tc>, window_params = [{transform_indices = @transform_0, window_bounds = array<i64: 16, 32>}, {transform_indices = @transform_1, window_bounds = array<i64: 16, 16>}, {pipeline_mode = #tpu.pipeline_mode<synchronous>, transform_indices = @transform_2, window_bounds = array<i64: 32, 16>}, {pipeline_mode = #tpu.pipeline_mode<synchronous>, transform_indices = @transform_3, window_bounds = array<i64: 16, 128>}, {transform_indices = @transform_4, window_bounds = array<i64: 8, 128>}]} {
    %c0 = arith.constant 0 : index
    %c0_0 = arith.constant 0 : index
    %0 = vector.load %arg1[%c0, %c0_0] : memref<16x32xbf16, #tpu.memory_space<vmem>>, vector<16x32xbf16>
    %c0_1 = arith.constant 0 : index
    %c0_2 = arith.constant 0 : index
    %1 = vector.load %arg2[%c0_1, %c0_2] : memref<16x16xf32, #tpu.memory_space<vmem>>, vector<16x16xf32>
    %c0_3 = arith.constant 0 : index
    %c0_4 = arith.constant 0 : index
    %2 = vector.load %arg3[%c0_3, %c0_4] : memref<32x16xbf16, #tpu.memory_space<vmem>>, vector<32x16xbf16>
    %c0_5 = arith.constant 0 : index
    %c0_6 = arith.constant 0 : index
    %3 = vector.load %arg4[%c0_5, %c0_6] : memref<16x128xbf16, #tpu.memory_space<vmem>>, vector<16x128xbf16>
    %cst = arith.constant dense<0.000000e+00> : vector<16x16xf32>
    %4 = tpu.matmul %0, %2, %cst {dimension_numbers = #tpu.dot_dimension_numbers<[1], [0], [0], [1], [0, 0, 1, 1], [], []>} : vector<16x32xbf16>, vector<32x16xbf16>, vector<16x16xf32> -> vector<16x16xf32>
    %5 = arith.mulf %4, %1 : vector<16x16xf32>
    %cst_7 = arith.constant dense<0.000000e+00> : vector<16xf32>
    %6 = vector.multi_reduction <add>, %5, %cst_7 [1] : vector<16x16xf32> to vector<16xf32>
    %7 = vector.shape_cast %6 : vector<16xf32> to vector<16x1xf32>
    %8 = arith.truncf %1 : vector<16x16xf32> to vector<16x16xbf16>
    %cst_8 = arith.constant dense<0.000000e+00> : vector<16x128xf32>
    %9 = tpu.matmul %8, %3, %cst_8 {dimension_numbers = #tpu.dot_dimension_numbers<[1], [0], [0], [1], [0, 0, 1, 1], [], []>} : vector<16x16xbf16>, vector<16x128xbf16>, vector<16x128xf32> -> vector<16x128xf32>
    %10 = tpu.iota {dimensions = array<i32: 1>} : vector<16x128xi32>
    %c3_i32 = arith.constant 3 : i32
    %11 = vector.broadcast %c3_i32 : i32 to vector<16x128xi32>
    %12 = arith.cmpi slt, %10, %11 : vector<16x128xi32>
    %cst_9 = arith.constant -1.000000e+30 : f32
    %13 = vector.broadcast %cst_9 : f32 to vector<16x128xf32>
    %14 = arith.select %12, %9, %13 : vector<16x128xi1>, vector<16x128xf32>
    %cst_10 = arith.constant dense<0xFF800000> : vector<16xf32>
    %15 = vector.multi_reduction <maximumf>, %14, %cst_10 [1] : vector<16x128xf32> to vector<16xf32>
    %16 = vector.shape_cast %15 : vector<16xf32> to vector<16x1xf32>
    %17 = arith.maximumf %7, %16 : vector<16x1xf32>
    %18 = arith.subf %7, %17 : vector<16x1xf32>
    %19 = math.exp %18 : vector<16x1xf32>
    %20 = vector.broadcast %17 : vector<16x1xf32> to vector<16x128xf32>
    %21 = arith.subf %14, %20 : vector<16x128xf32>
    %22 = math.exp %21 : vector<16x128xf32>
    %cst_11 = arith.constant dense<0.000000e+00> : vector<16xf32>
    %23 = vector.multi_reduction <add>, %22, %cst_11 [1] : vector<16x128xf32> to vector<16xf32>
    %24 = vector.shape_cast %23 : vector<16xf32> to vector<16x1xf32>
    %25 = arith.addf %19, %24 : vector<16x1xf32>
    %26 = math.log %25 : vector<16x1xf32>
    %27 = arith.addf %17, %26 : vector<16x1xf32>
    %28 = arith.subf %27, %7 : vector<16x1xf32>
    %c16_i32 = arith.constant 16 : i32
    %29 = arith.muli %arg0, %c16_i32 : i32
    %30 = tpu.iota {dimensions = array<i32: 0>} : vector<16x1xi32>
    %31 = vector.broadcast %29 : i32 to vector<16x1xi32>
    %32 = arith.addi %31, %30 : vector<16x1xi32>
    %c16_i32_12 = arith.constant 16 : i32
    %33 = vector.broadcast %c16_i32_12 : i32 to vector<16x1xi32>
    %34 = arith.cmpi slt, %32, %33 : vector<16x1xi32>
    %cst_13 = arith.constant 0.000000e+00 : f32
    %35 = vector.broadcast %cst_13 : f32 to vector<16x1xf32>
    %36 = arith.select %34, %28, %35 : vector<16x1xi1>, vector<16x1xf32>
    %37 = vector.shape_cast %36 : vector<16x1xf32> to vector<1x16x1xf32>
    %cst_14 = arith.constant dense<0.000000e+00> : vector<1xf32>
    %38 = vector.multi_reduction <add>, %37, %cst_14 [1, 2] : vector<1x16x1xf32> to vector<1xf32>
    %39 = vector.shape_cast %38 : vector<1xf32> to vector<1x1x1xf32>
    %40 = vector.extract %39[0, 0, 0] : f32 from vector<1x1x1xf32>
    %41 = vector.broadcast %40 : f32 to vector<8x128xf32>
    %c0_15 = arith.constant 0 : index
    %c0_16 = arith.constant 0 : index
    %42 = vector.load %arg5[%c0_15, %c0_16] : memref<8x128xf32, #tpu.memory_space<vmem>>, vector<8x128xf32>
    tpu.vector_store %arg5[%c0_15, %c0_16], %41 {strides = array<i32>} : memref<8x128xf32, #tpu.memory_space<vmem>>, vector<8x128xf32>,
    return
  }
  func.func @transform_0(%arg0: i32) -> (i32, i32) {
    %c0_i32 = arith.constant 0 : i32
    %c0_i32_0 = arith.constant 0 : i32
    return %arg0, %c0_i32 : i32, i32
  }
  func.func @transform_1(%arg0: i32) -> (i32, i32) {
    %c0_i32 = arith.constant 0 : i32
    %c0_i32_0 = arith.constant 0 : i32
    return %arg0, %c0_i32 : i32, i32
  }
  func.func @transform_2(%arg0: i32) -> (i32, i32) {
    %c0_i32 = arith.constant 0 : i32
    %c0_i32_0 = arith.constant 0 : i32
    %c0_i32_1 = arith.constant 0 : i32
    return %c0_i32, %c0_i32_0 : i32, i32
  }
  func.func @transform_3(%arg0: i32) -> (i32, i32) {
    %c0_i32 = arith.constant 0 : i32
    %c0_i32_0 = arith.constant 0 : i32
    %c0_i32_1 = arith.constant 0 : i32
    return %c0_i32, %c0_i32_0 : i32, i32
  }
  func.func @transform_4(%arg0: i32) -> (i32, i32) {
    %c0_i32 = arith.constant 0 : i32
    %c0_i32_0 = arith.constant 0 : i32
    return %arg0, %c0_i32 : i32, i32
  }
}

</mosaic_0001>

<bundles_post_ra>
// kernel: tpu_custom_call.1
= control target key start
LH: loop header
LB: loop body
LE: loop exit
PB: predicated region body
PF: predicated region fallthrough
CT: control target
= control target key end

     0   :  { %v298_v1 = vmov 0.0   ;;  %vm299_vm0 = vmmov 0   ;;  %vm93_vm1 = vcmask 130048   ;;  %s359_s0 = inlined_call_operand.vmem [shape: bf16[16,32], index: 0, kind: input, shape index: {}]   ;;  %s360_s1 = inlined_call_operand.vmem [shape: f32[16,16], index: 1, kind: input, shape index: {}]   ;;  %s361_s2 = inlined_call_operand.vmem [shape: bf16[32,16], index: 2, kind: input, shape index: {}]   ;;  %s362_s3 = inlined_call_operand.vmem [shape: bf16[16,128], index: 3, kind: input, shape index: {}]   ;;  %s363_s4 = inlined_call_operand.hbm [shape: f32[8,128], index: 4, kind: output, shape index: {}]  }
   0x1   :  { %v258_v0 = vld [vmem:[%s361_s2] sm:$0xff]   ;;  %239 = vmatprep.subr.bf16.mxu0 %v298_v1  ;;  %247 = vmatprep.subr.bf16.mxu1 %v298_v1  ;;  %v260_v3 = vld [vmem:[%s361_s2 + $0x8] sm:$0xff]  }
   0x2   :  { %v259_v2 = vld [vmem:[%s362_s3] sm:$0xff]   ;;  %240 = vmatpush3.bf16.msra.mxu0 %v258_v0  ;;  %249 = vmatprep.mubr.msk.bf16.mxu1 %vm299_vm0, %v298_v1  ;;  %v22_v5 = vld [vmem:[%s360_s1 + $0x8] sm:$0xff] }
   0x3   :  { %248 = vmatpush3.bf16.msra.mxu1 %v259_v2  ;;  %241 = vmatprep.subr.bf16.mxu0 %v298_v1  ;;  %v21_v4 = vld [vmem:[%s360_s1] sm:$0xff] }
   0x4   :  { %v100_v6 = vpack.c.bf16 %v22_v5, %v21_v4  ;;  %243 = vmatprep.mubr.msk.bf16.mxu0 %vm299_vm0, %v298_v1 }
   0x5   :  { %9 = vsyncpa [#allocation3], 0  ;;  %v261_v7 = vld [vmem:[%s359_s0] sm:$0xff]   ;;  %vm46_vm2 = vcmask 261120   ;;  %v151_v8 = vlaneseq  ;;  %vm199_vm4 = vcmask 7168   ;;  %s300_s0 = smov [#allocation2]  }
   0x6   :  { %242 = vmatpush3.bf16.msra.mxu0 %v260_v3  ;;  %250 = vmatmul.mubr.msk.bf16.vlgmr.msra.gmra.mrb[0].mxu1 %vm93_vm1, %v100_v6  ;;  %s220_s1 = sshll.u32 %s300_s0, 4  ;;  %s221_s1 = int_to_ptr.vmem [resolvable:$true] %s220_s1 }
   0x7   :  { %v152_v9 = vand.u32 127, %v151_v8  ;;  %s274_s26 = scalar_lea.vmem %s221_s1, 128  ;;  %p279_p1 = scmp.lt.s32.totalorder %s221_s1, %s221_s1 }
   0x8   :  { %p275_p0 = scmp.ne.s32.totalorder %s221_s1, %s274_s26  ;;  %p280_p2 = scmp.lt.s32.totalorder %s274_s26, %s274_s26 }
   0x9   :  { %244 = vmatmul.mubr.msk.bf16.vlgmr.msra.gmra.mrb[0].mxu0 %vm46_vm2, %v261_v7  ;;  %vm153_vm3 = vcmp.lt.s32.totalorder %v152_v9, 3 }
   0xa   :  { %p281_p3 = por %p280_p2, %p279_p1 }
   0xc   :  { %p282_p4 = pnand %p281_p3, %p275_p0 }
  0xd9   :  { %v144_v10 = vpop.f32.mrb[0].mxu1 }
  0xda   :  { %v154_v11 = vsel %vm153_vm3, %v144_v10, -1e+30  ;;  %v251_v12 = vpop.f32.mrb[1].mxu1 }
  0xdb   :  { %156 = vmax.xlane.f32.xlu1 %v154_v11  ;;  %v147_v13 = vpop.f32.mrb[2].mxu1 }
  0xdc   :  { %v84_v14 = vpop.f32.mrb[0].mxu0  ;;  %v252_v15 = vpop.f32.mrb[3].mxu1  ;;  %v155_v16 = vsel %vm153_vm3, %v147_v13, -1e+30 }
  0xdd   :  { %v91_v17 = vmul.f32 %v84_v14, %v21_v4  ;;  %v245_v18 = vpop.f32.mrb[1].mxu0 }
  0xde   :  { %v87_v19 = vpop.f32.mrb[2].mxu0 }
  0xdf   :  { %v92_v20 = vmul.f32 %v87_v19, %v22_v5  ;;  %v246_v21 = vpop.f32.mrb[3].mxu0  ;;  %158 = vmax.xlane.f32.xlu1 %v155_v16  ;;  %v94_v22 = vsel %vm93_vm1, %v91_v17, 0.0 }
  0xe0   :  { %95 = vadd.xlane.f32.xlu0 %v94_v22 }
  0xe1   :  { %v97_v23 = vsel %vm93_vm1, %v92_v20, 0.0 }
  0xe4   :  { %98 = vadd.xlane.f32.xlu0 %v97_v23 }
 0x168   :  { %v157_v24 = vpop.xlane.xlu1 %156 }
 0x16c   :  { %v159_v28 = vpop.xlane.xlu1 %158 }
 0x16d   :  { %v96_v25 = vpop.xlane.xlu0 %95 }
 0x16e   :  { %v160_v26 = vmax.f32 %v96_v25, %v157_v24 }
 0x170   :  { %v168_v27 = vsub.f32 %v154_v11, %v160_v26  ;;  %v162_v36 = vsub.f32 %v96_v25, %v160_v26 }
 0x171   :  { %v99_v29 = vpop.xlane.xlu0 %98 }
 0x172   :  { %v170_v30 = vmul.f32 1.442695, %v168_v27  ;;  %v161_v31 = vmax.f32 %v99_v29, %v159_v28  ;;  %v164_v37 = vmul.f32 1.442695, %v162_v36 }
 0x174   :  { %v169_v32 = vsub.f32 %v155_v16, %v161_v31  ;;  %262 = vpow2.f32 %v170_v30  ;;  %v163_v38 = vsub.f32 %v99_v29, %v161_v31 }
 0x176   :  { %v172_v33 = vmul.f32 1.442695, %v169_v32  ;;  %v166_v39 = vmul.f32 1.442695, %v163_v38 }
 0x178   :  { %264 = vpow2.f32 %v172_v33 }
 0x179   :  { %266 = vpow2.f32 %v164_v37 }
 0x17a   :  { %268 = vpow2.f32 %v166_v39 }
 0x17e   :  { %v263_v34 = vpop.eup %262 }
 0x17f   :  { %174 = vadd.xlane.f32.xlu0 %v263_v34 }
 0x182   :  { %v265_v35 = vpop.eup %264 }
 0x183   :  { %176 = vadd.xlane.f32.xlu1 %v265_v35  ;;  %v267_v40 = vpop.eup %266 }
 0x184   :  { %v269_v43 = vpop.eup %268 }
 0x20c   :  { %v175_v41 = vpop.xlane.xlu0 %174 }
 0x20d   :  { %v178_v42 = vadd.f32 %v267_v40, %v175_v41 }
 0x20f   :  { %270 = vlog2.f32 %v178_v42 }
 0x210   :  { %v177_v44 = vpop.xlane.xlu1 %176 }
 0x211   :  { %v179_v45 = vadd.f32 %v269_v43, %v177_v44 }
 0x213   :  { %272 = vlog2.f32 %v179_v45 }
 0x219   :  { %v271_v46 = vpop.eup %270 }
 0x21a   :  { %v181_v47 = vmul.f32 0.6931472, %v271_v46 }
 0x21c   :  { %v184_v48 = vadd.f32 %v181_v47, %v160_v26 }
 0x21d   :  { %v273_v49 = vpop.eup %272 }
 0x21e   :  { %v183_v50 = vmul.f32 0.6931472, %v273_v49  ;;  %v186_v52 = vsub.f32 %v184_v48, %v96_v25 }
 0x220   :  { %v185_v51 = vadd.f32 %v183_v50, %v161_v31  ;;  %v200_v54 = vsel %vm199_vm4, %v186_v52, 0.0 }
 0x222   :  { %v187_v53 = vsub.f32 %v185_v51, %v99_v29 }
 0x224   :  { %v201_v55 = vsel %vm199_vm4, %v187_v53, 0.0 }
 0x225   :  { %v202_v56 = vadd.f32 %v201_v55, %v200_v54 }
 0x227   :  { %203 = vadd.xlane.f32.xlu0 %v202_v56 }
 0x2b4   :  { %v204_v57 = vpop.xlane.xlu0 %203 }
 0x2b5   :  { %v205_v58 = vrot.slane %v204_v57, 4 }
 0x2b7   :  { %v206_v59 = vadd.f32 %v205_v58, %v204_v57 }
 0x2b9   :  { %v207_v60 = vrot.slane %v206_v59, 2 }
 0x2bb   :  { %v208_v61 = vadd.f32 %v207_v60, %v206_v59 }
 0x2bd   :  { %v209_v62 = vrot.slane %v208_v61, 1 }
 0x2bf   :  { %v210_v63 = vadd.f32 %v209_v62, %v208_v61 }
 0x2c1   :  { %253 = vpush %v210_v63 }
 0x2f2   :  { %s254_s2 = spop %253 }
 0x2f3   :  { %v212_v0 = vstv %s254_s2 }
 0x2f4   :  { %213 = vst [vmem:[#allocation2] sm:$0xff] %v212_v0 }
 0x2f5   :  { %285 = shalt.err (!%p282_p4)
}
 0x2f6   :  { %s286_s29 = scalar_lea.hbm %s363_s4, 128 }
 0x2f7   :  { %p287_p5 = scmp.ne.s32.totalorder %s363_s4, %s286_s29  ;;  %p290_p6 = scmp.lt.u32.totalorder %s286_s29, %s363_s4 }
 0x2f9   :  { %p292_p7 = pnand %p290_p6, %p287_p5 }
 0x2fb   :  { %295 = shalt.err (!%p292_p7)
}
 0x2fc   :  { %223 = dma.vmem_to_hbm [thread:$0]  %s221_s1, 128, %s363_s4, [#allocation3]  }
 0x2fd   :  { %296 = dma.done.wait [#allocation3], 128  }
 0x2fe   :  { %297 = vsyncadd [#allocation3], 4294967168 }
 0x2ff   :  { %227 = vsyncpa [#allocation3], 1 }

</bundles_post_ra>
